<compile_context>
chip_gen: v7x
topology: tpu7x:2x2x1
jax: 0.10.0
libtpu: 0.0.40
codegen_flags: <defaults>
</compile_context>

<pallas_src>
import functools

import jax
import jax.numpy as jnp
from jax.experimental import pallas as pl
from jax.experimental.pallas import tpu as pltpu


_LANE = 128
_SUBLANE = 8


def _round_up(x, m):
    return ((x + m - 1) // m) * m


@functools.lru_cache(maxsize=None)
def _vmem_budget_bytes():
    """Scoped-VMEM budget with headroom (~3/4 of physical per TensorCore)."""
    try:
        cap = int(pltpu.get_tpu_info().vmem_capacity_bytes)
    except Exception:
        cap = 64 * 1024 * 1024            # conservative (v7x) default
    return cap * 3 // 4                   # ~48 MiB on v7x, ~96 MiB on v5e/v6e


def _choose_tn(in_f, out_f):
    """Largest lane-dense N tile that fits the per-step VMEM accounting."""
    budget = _vmem_budget_bytes()
    n_pad128 = _round_up(out_f, _LANE)
    tn = _LANE
    for cand in (512, 256, 128):
        w_bytes = 2 * 2 * cand * in_f * 4            # mu+sigma, double-buffered
        scratch = cand * in_f * 4                    # fused-weight VMEM scratch
        xo_bytes = 2 * 128 * in_f * 4 + 2 * 128 * cand * 4   # x / out tiles
        if w_bytes + scratch + xo_bytes <= int(budget * 0.8):
            tn = cand
            break
    # Don't blow up out_features padding (>25%) just to reach a bigger tile.
    while tn > _LANE and (_round_up(out_f, tn) - n_pad128) * 4 > n_pad128:
        tn //= 2
    return tn


# ----------------------------------------------------------------------------
# Kernels
# ----------------------------------------------------------------------------

def _noisy_linear_kernel(x_ref, wmu_ref, wsig_ref, epsi_ref, epso_ref, b_ref,
                         o_ref, wf_ref):
    # Rebuild the rank-1 epsilon tile and fuse the noisy weight ONLY when the
    # N block changes (the weight block is resident across the inner M loop).
    @pl.when(pl.program_id(1) == 0)
    def _():
        eps = epsi_ref[...] * epso_ref[...]            # (K,1)*(1,TN) -> (K,TN)
        wf_ref[...] = wmu_ref[...] + wsig_ref[...] * eps

    # Standard (TM,K)x(K,TN) MXU contraction on the pre-transposed weights.
    y = jnp.dot(x_ref[...], wf_ref[...], preferred_element_type=jnp.float32)
    o_ref[...] = (y + b_ref[...]).astype(o_ref.dtype)


def _plain_linear_kernel(x_ref, wmu_ref, b_ref, o_ref):
    # Deterministic path: stream only W_mu / b_mu (no sigma / eps traffic).
    y = jnp.dot(x_ref[...], wmu_ref[...], preferred_element_type=jnp.float32)
    o_ref[...] = (y + b_ref[...]).astype(o_ref.dtype)


# ----------------------------------------------------------------------------
# One-time parameter prep (pad + pre-transpose) and the jitted forward
# ----------------------------------------------------------------------------

def prepare_noisy_linear_params(params):
    """One-time prep: pad out_features to a tile multiple and pre-transpose
    weights to (in_features, n_pad). Call once after init / reset_noise — NOT
    inside the per-step forward (avoids per-call HBM copies of the weights)."""
    wmu = params["weight_mu"]
    wsig = params["weight_sigma"]
    out_f, in_f = wmu.shape
    tn = _choose_tn(in_f, out_f)
    n_pad = _round_up(out_f, tn)

    def pad_rows(w):                            # (out_f, in_f) -> (n_pad, in_f)
        return w if n_pad == out_f else jnp.pad(w, ((0, n_pad - out_f), (0, 0)))

    def pad_vec(v):                             # (out_f,) -> (n_pad,)
        return v if n_pad == out_f else jnp.pad(v, (0, n_pad - out_f))

    prepped = dict(
        wmu_t=pad_rows(wmu).T,                                    # (in_f, n_pad)
        wsig_t=pad_rows(wsig).T,                                  # (in_f, n_pad)
        eps_in_col=params["eps_in"].reshape(in_f, 1),             # (in_f, 1)
        eps_out_row=pad_vec(params["eps_out"]).reshape(1, n_pad), # (1, n_pad)
        bias_mu_row=pad_vec(params["bias_mu"]).reshape(1, n_pad),
        bias_sigma_row=pad_vec(params["bias_sigma"]).reshape(1, n_pad),
    )
    meta = dict(out_features=out_f, tn=tn)
    return prepped, meta


@functools.partial(jax.jit, static_argnames=("tn", "out_features", "use_noise"))
def _noisy_linear_fwd(x, wmu_t, wsig_t, eps_in_col, eps_out_row,
                      bias_mu_row, bias_sigma_row, *,
                      tn, out_features, use_noise):
    B, in_f = x.shape
    n_pad = wmu_t.shape[1]
    nn = n_pad // tn

    tm = _LANE if B >= _LANE else _round_up(max(B, 1), _SUBLANE)
    b_pad = _round_up(B, tm)
    nm = b_pad // tm
    x_p = x if b_pad == B else jnp.pad(x, ((0, b_pad - B), (0, 0)))

    # Effective bias is an O(N) elementwise op: do it in XLA, feed one row.
    b_eff = (bias_mu_row + bias_sigma_row * eps_out_row) if use_noise \
        else bias_mu_row

    budget = _vmem_budget_bytes()
    n_w_streams = 2 if use_noise else 1

    # Deeper weight prefetch when there are several inner M steps to hide the
    # next N block's weight burst behind (re-checked against the VMEM budget).
    w_bufs = 2
    if nm >= 2 and nn >= 2:
        need = (n_w_streams * 3 * tn * in_f * 4
                + (tn * in_f * 4 if use_noise else 0)
                + 2 * tm * in_f * 4 + 2 * tm * tn * 4)
        if need <= int(budget * 0.8):
            w_bufs = 3

    def make_w_spec():
        if w_bufs > 2:
            return pl.BlockSpec((in_f, tn), lambda j, i: (0, j),
                                pipeline_mode=pl.Buffered(w_bufs))
        return pl.BlockSpec((in_f, tn), lambda j, i: (0, j))

    x_spec = pl.BlockSpec((tm, in_f), lambda j, i: (i, 0))
    row_spec = pl.BlockSpec((1, tn), lambda j, i: (0, j))
    o_spec = pl.BlockSpec((tm, tn), lambda j, i: (i, j))

    per_step = 4 * (n_w_streams * w_bufs * in_f * tn        # weight streams
                    + (in_f * tn if use_noise else 0)       # fused-w scratch
                    + 2 * tm * in_f                         # x (double-buffered)
                    + 2 * tm * tn                           # out (double-buffered)
                    + 2 * (in_f + 3 * tn))                  # eps / bias rows
    vmem_limit = int(min(budget, max(per_step + (4 << 20), 16 << 20)))

    flops = 2 * b_pad * in_f * n_pad
    bytes_accessed = 4 * (b_pad * in_f * nn                 # x re-read per N tile
                          + n_w_streams * n_pad * in_f      # weights read once
                          + b_pad * n_pad                   # output
                          + 2 * n_pad + in_f)               # bias / eps vectors
    cost = pl.CostEstimate(flops=flops, transcendentals=0,
                           bytes_accessed=bytes_accessed)

    if use_noise:
        kernel = _noisy_linear_kernel
        in_specs = [x_spec, make_w_spec(), make_w_spec(),
                    pl.BlockSpec((in_f, 1), lambda j, i: (0, 0)),
                    row_spec, row_spec]
        args = (x_p, wmu_t, wsig_t, eps_in_col, eps_out_row, b_eff)
        scratch = [pltpu.VMEM((in_f, tn), jnp.float32)]
    else:
        kernel = _plain_linear_kernel
        in_specs = [x_spec, make_w_spec(), row_spec]
        args = (x_p, wmu_t, b_eff)
        scratch = []

    out_padded = pl.pallas_call(
        kernel,
        out_shape=jax.ShapeDtypeStruct((b_pad, n_pad), x.dtype),
        grid_spec=pltpu.PrefetchScalarGridSpec(
            num_scalar_prefetch=0,
            grid=(nn, nm),                   # N outer (weight reuse), M inner
            in_specs=in_specs,
            out_specs=o_spec,
            scratch_shapes=scratch),
        compiler_params=pltpu.CompilerParams(
            # Inner M axis must be "arbitrary": the pl.when(i==0) weight-fuse
            # init must run for every N block on whichever core owns it.
            dimension_semantics=("parallel", "arbitrary"),
            vmem_limit_bytes=vmem_limit),
        cost_estimate=cost,
    )(*args)

    return out_padded[:B, :out_features]


def noisy_linear(x, prepped, meta, use_noise=True):
    """Forward pass of NoisyLinear on pre-prepped (padded/transposed) params."""
    return _noisy_linear_fwd(
        x, prepped["wmu_t"], prepped["wsig_t"],
        prepped["eps_in_col"], prepped["eps_out_row"],
        prepped["bias_mu_row"], prepped["bias_sigma_row"],
        tn=meta["tn"], out_features=meta["out_features"], use_noise=use_noise)


# ----------------------------------------------------------------------------
# Parameter / noise init (plain JAX glue, mirrors the PyTorch module).
# Noise is kept factorised (eps_in, eps_out) — the full (out,in) epsilon
# matrix is never materialized for the kernel.
# ----------------------------------------------------------------------------

def _scale_noise(key, size):
    # PyTorch: x.sign() * sqrt(|x|) with x ~ N(0, 1)
    x = jax.random.normal(key, (size,), dtype=jnp.float32)
    return jnp.sign(x) * jnp.sqrt(jnp.abs(x))


def init_noisy_linear_params(key, in_features, out_features,
                             std_init=0.1, bias=True):
    """Deterministic parameter + noise init mirroring NoisyLinear.__init__."""
    k_wmu, k_bmu, k_ein, k_eout = jax.random.split(key, 4)
    mu_range = 1.0 / jnp.sqrt(jnp.float32(in_features))

    weight_mu = jax.random.uniform(
        k_wmu, (out_features, in_features), dtype=jnp.float32,
        minval=-mu_range, maxval=mu_range)
    weight_sigma = jnp.full((out_features, in_features),
                            std_init / jnp.sqrt(jnp.float32(in_features)),
                            dtype=jnp.float32)
    if bias:
        bias_mu = jax.random.uniform(
            k_bmu, (out_features,), dtype=jnp.float32,
            minval=-mu_range, maxval=mu_range)
        bias_sigma = jnp.full((out_features,),
                              std_init / jnp.sqrt(jnp.float32(out_features)),
                              dtype=jnp.float32)
    else:
        bias_mu = jnp.zeros((out_features,), dtype=jnp.float32)
        bias_sigma = jnp.zeros((out_features,), dtype=jnp.float32)

    # reset_noise(): factorised Gaussian noise (rank-1; kept factorised).
    eps_in = _scale_noise(k_ein, in_features)      # (in,)
    eps_out = _scale_noise(k_eout, out_features)   # (out,)  (= bias_epsilon)

    return dict(weight_mu=weight_mu, weight_sigma=weight_sigma,
                bias_mu=bias_mu, bias_sigma=bias_sigma,
                eps_in=eps_in, eps_out=eps_out)


# ----------------------------------------------------------------------------
# Demo + reference check
# ----------------------------------------------------------------------------

if __name__ == "__main__":
    key = jax.random.PRNGKey(0)
    k_params, k_x = jax.random.split(key)

    B, in_features, out_features = 8, 32, 16
    params = init_noisy_linear_params(k_params, in_features, out_features,
                                      std_init=0.1, bias=True)
    x = jax.random.normal(k_x, (B, in_features), dtype=jnp.float32)

    # One-time prep (pad + pre-transpose) — outside the per-step forward.
    prepped, meta = prepare_noisy_linear_params(params)

    # Default module state: training=False but sampling=True -> use_noise=True
    y = noisy_linear(x, prepped, meta, use_noise=True)
    jax.block_until_ready(y)

    w_eps = jnp.outer(params["eps_out"], params["eps_in"])   # eps_out.ger(eps_in)
    w_eff = params["weight_mu"] + params["weight_sigma"] * w_eps
    b_eff = params["bias_mu"] + params["bias_sigma"] * params["eps_out"]
    y_ref = x @ w_eff.T + b_eff
    assert y.shape == (B, out_features)
    assert jnp.allclose(y, y_ref, atol=2e-5, rtol=1e-5), "noisy path mismatch"

    # Eval path (noise_override=False): dedicated kernel, mu-only streams.
    y_det = noisy_linear(x, prepped, meta, use_noise=False)
    jax.block_until_ready(y_det)
    y_det_ref = x @ params["weight_mu"].T + params["bias_mu"]
    assert jnp.allclose(y_det, y_det_ref, atol=2e-5, rtol=1e-5), \
        "deterministic path mismatch"

    print("KERNEL_OK")
</pallas_src>

<mosaic_0001>
module attributes {stable_mosaic.version = 11 : i64} {
  func.func @_noisy_linear_kernel(%arg0: i32, %arg1: i32, %arg2: memref<8x32xf32, #tpu.memory_space<vmem>>, %arg3: memref<32x128xf32, #tpu.memory_space<vmem>>, %arg4: memref<32x128xf32, #tpu.memory_space<vmem>>, %arg5: memref<32x1xf32, #tpu.memory_space<vmem>>, %arg6: memref<1x128xf32, #tpu.memory_space<vmem>>, %arg7: memref<1x128xf32, #tpu.memory_space<vmem>>, %arg8: memref<8x128xf32, #tpu.memory_space<vmem>>, %arg9: memref<32x128xf32, #tpu.memory_space<vmem>>) attributes {dimension_semantics = [#tpu.dimension_semantics<parallel>, #tpu.dimension_semantics<arbitrary>], iteration_bounds = array<i64: 1, 1>, scalar_prefetch = 0 : i64, scratch_operands = 1 : i64, tpu.core_type = #tpu.core_type<tc>, window_params = [{transform_indices = @transform_0, window_bounds = array<i64: 8, 32>}, {transform_indices = @transform_1, window_bounds = array<i64: 32, 128>}, {transform_indices = @transform_2, window_bounds = array<i64: 32, 128>}, {pipeline_mode = #tpu.pipeline_mode<synchronous>, transform_indices = @transform_3, window_bounds = array<i64: 32, 1>}, {transform_indices = @transform_4, window_bounds = array<i64: 1, 128>}, {transform_indices = @transform_5, window_bounds = array<i64: 1, 128>}, {transform_indices = @transform_6, window_bounds = array<i64: 8, 128>}]} {
    %c0_i32 = arith.constant 0 : i32
    %0 = arith.cmpi eq, %arg1, %c0_i32 : i32
    %1 = arith.extui %0 : i1 to i32
    %c0_i32_0 = arith.constant 0 : i32
    %2 = arith.cmpi ne, %1, %c0_i32_0 : i32
    scf.if %2 {
      %c0_8 = arith.constant 0 : index
      %c0_9 = arith.constant 0 : index
      %10 = vector.load %arg5[%c0_8, %c0_9] : memref<32x1xf32, #tpu.memory_space<vmem>>, vector<32x1xf32>
      %c0_10 = arith.constant 0 : index
      %c0_11 = arith.constant 0 : index
      %11 = vector.load %arg6[%c0_10, %c0_11] : memref<1x128xf32, #tpu.memory_space<vmem>>, vector<1x128xf32>
      %12 = vector.broadcast %10 : vector<32x1xf32> to vector<32x128xf32>
      %13 = vector.broadcast %11 : vector<1x128xf32> to vector<32x128xf32>
      %14 = arith.mulf %12, %13 : vector<32x128xf32>
      %c0_12 = arith.constant 0 : index
      %c0_13 = arith.constant 0 : index
      %15 = vector.load %arg3[%c0_12, %c0_13] : memref<32x128xf32, #tpu.memory_space<vmem>>, vector<32x128xf32>
      %c0_14 = arith.constant 0 : index
      %c0_15 = arith.constant 0 : index
      %16 = vector.load %arg4[%c0_14, %c0_15] : memref<32x128xf32, #tpu.memory_space<vmem>>, vector<32x128xf32>
      %17 = arith.mulf %16, %14 : vector<32x128xf32>
      %18 = arith.addf %15, %17 : vector<32x128xf32>
      %c0_16 = arith.constant 0 : index
      %c0_17 = arith.constant 0 : index
      %19 = vector.load %arg9[%c0_16, %c0_17] : memref<32x128xf32, #tpu.memory_space<vmem>>, vector<32x128xf32>
      tpu.vector_store %arg9[%c0_16, %c0_17], %18 {strides = array<i32>} : memref<32x128xf32, #tpu.memory_space<vmem>>, vector<32x128xf32>,
    } else {
    }
    %c0 = arith.constant 0 : index
    %c0_1 = arith.constant 0 : index
    %3 = vector.load %arg2[%c0, %c0_1] : memref<8x32xf32, #tpu.memory_space<vmem>>, vector<8x32xf32>
    %c0_2 = arith.constant 0 : index
    %c0_3 = arith.constant 0 : index
    %4 = vector.load %arg9[%c0_2, %c0_3] : memref<32x128xf32, #tpu.memory_space<vmem>>, vector<32x128xf32>
    %cst = arith.constant dense<0.000000e+00> : vector<8x128xf32>
    %5 = tpu.matmul %3, %4, %cst {dimension_numbers = #tpu.dot_dimension_numbers<[1], [0], [0], [1], [0, 0, 1, 1], [], []>} : vector<8x32xf32>, vector<32x128xf32>, vector<8x128xf32> -> vector<8x128xf32>
    %c0_4 = arith.constant 0 : index
    %c0_5 = arith.constant 0 : index
    %6 = vector.load %arg7[%c0_4, %c0_5] : memref<1x128xf32, #tpu.memory_space<vmem>>, vector<1x128xf32>
    %7 = vector.broadcast %6 : vector<1x128xf32> to vector<8x128xf32>
    %8 = arith.addf %5, %7 : vector<8x128xf32>
    %c0_6 = arith.constant 0 : index
    %c0_7 = arith.constant 0 : index
    %9 = vector.load %arg8[%c0_6, %c0_7] : memref<8x128xf32, #tpu.memory_space<vmem>>, vector<8x128xf32>
    tpu.vector_store %arg8[%c0_6, %c0_7], %8 {strides = array<i32>} : memref<8x128xf32, #tpu.memory_space<vmem>>, vector<8x128xf32>,
    return
  }
  func.func @transform_0(%arg0: i32, %arg1: i32) -> (i32, i32) {
    %c0_i32 = arith.constant 0 : i32
    %c0_i32_0 = arith.constant 0 : i32
    return %arg1, %c0_i32 : i32, i32
  }
  func.func @transform_1(%arg0: i32, %arg1: i32) -> (i32, i32) {
    %c0_i32 = arith.constant 0 : i32
    %c0_i32_0 = arith.constant 0 : i32
    return %c0_i32, %arg0 : i32, i32
  }
  func.func @transform_2(%arg0: i32, %arg1: i32) -> (i32, i32) {
    %c0_i32 = arith.constant 0 : i32
    %c0_i32_0 = arith.constant 0 : i32
    return %c0_i32, %arg0 : i32, i32
  }
  func.func @transform_3(%arg0: i32, %arg1: i32) -> (i32, i32) {
    %c0_i32 = arith.constant 0 : i32
    %c0_i32_0 = arith.constant 0 : i32
    %c0_i32_1 = arith.constant 0 : i32
    return %c0_i32, %c0_i32_0 : i32, i32
  }
  func.func @transform_4(%arg0: i32, %arg1: i32) -> (i32, i32) {
    %c0_i32 = arith.constant 0 : i32
    %c0_i32_0 = arith.constant 0 : i32
    return %c0_i32, %arg0 : i32, i32
  }
  func.func @transform_5(%arg0: i32, %arg1: i32) -> (i32, i32) {
    %c0_i32 = arith.constant 0 : i32
    %c0_i32_0 = arith.constant 0 : i32
    return %c0_i32, %arg0 : i32, i32
  }
  func.func @transform_6(%arg0: i32, %arg1: i32) -> (i32, i32) {
    %c0_i32 = arith.constant 0 : i32
    return %arg1, %arg0 : i32, i32
  }
}

</mosaic_0001>

<bundles_post_ra>
// kernel: _noisy_linear_fwd.1
= control target key start
LH: loop header
LB: loop body
LE: loop exit
PB: predicated region body
PF: predicated region fallthrough
CT: control target
= control target key end

     0   :  { %11 = vsyncpa [#allocation4], 0  ;;  %s382_s0 = inlined_call_operand.vmem [shape: f32[8,32], index: 0, kind: input, shape index: {}]   ;;  %s383_s1 = inlined_call_operand.vmem [shape: f32[32,128], index: 1, kind: input, shape index: {}]   ;;  %s384_s2 = inlined_call_operand.hbm [shape: f32[32,128], index: 2, kind: input, shape index: {}]   ;;  %s385_s3 = inlined_call_operand.vmem [shape: f32[32,1], index: 3, kind: input, shape index: {}]   ;;  %s386_s4 = inlined_call_operand.vmem [shape: f32[1,128], index: 4, kind: input, shape index: {}]   ;;  %s387_s5 = inlined_call_operand.vmem [shape: f32[1,128], index: 5, kind: input, shape index: {}]   ;;  %s388_s6 = inlined_call_operand.hbm [shape: f32[8,128], index: 6, kind: output, shape index: {}]  }
   0x1   :  { %12 = vsyncpa [#allocation5], 0  ;;  %s282_s21 = smov [#allocation3]   ;;  %s234_s25 = scalar_lea.hbm %s384_s2, 512 }
   0x2   :  { %s22_s22 = sshll.u32 %s282_s21, 4  ;;  %p235_p0 = scmp.ne.s32.totalorder %s384_s2, %s234_s25  ;;  %s23_s22 = int_to_ptr.vmem [resolvable:$true] %s22_s22 }
   0x3   :  { %p238_p1 = scmp.lt.u32.totalorder %s234_s25, %s384_s2 }
   0x5   :  { %p240_p2 = pnand %p238_p1, %p235_p0 }
   0x7   :  { %243 = shalt.err (!%p240_p2)
}
   0x8   :  { %s244_s30 = scalar_lea.vmem %s23_s22, 512  ;;  %p249_p4 = scmp.lt.s32.totalorder %s23_s22, %s23_s22 }
   0x9   :  { %p245_p3 = scmp.ne.s32.totalorder %s23_s22, %s244_s30  ;;  %p250_p5 = scmp.lt.s32.totalorder %s244_s30, %s244_s30 }
   0xb   :  { %p251_p6 = por %p250_p5, %p249_p4 }
   0xd   :  { %p252_p7 = pnand %p251_p6, %p245_p3 }
   0xf   :  { %255 = shalt.err (!%p252_p7)
}
  0x10   :  { %s283_s7 = smov 128   ;;  %s284_s8 = smov 8  }
  0x11   :  { %28 = dma.hbm_to_vmem [thread:$0]  %s384_s2, 512, %s23_s22, [#allocation4], %s283_s7, %s283_s7, %s284_s8  }
  0x12   :  { %278 = dma.done.wait [#allocation4], 512  }
  0x13   :  { %279 = vsyncadd [#allocation4], 4294966784  ;;  %v285_v0 = vmov 0   ;;  %v44_v1 = vld [vmem:[%s385_s3 + $0x10] sm:$0xff]  ;;  %v42_v2 = vld [vmem:[%s385_s3] sm:$0xff]  ;;  %v286_v5 = vmov 0.0|0.0  }
  0x14   :  { %233 = vset.pattern.permute.xlu1 %v285_v0  ;;  %232 = vset.pattern.permute.xlu0 %v285_v0  ;;  %v45_v3 = vld [vmem:[%s385_s3 + $0x18] sm:$0xff]  ;;  %v43_v4 = vld [vmem:[%s385_s3 + $0x8] sm:$0xff]  ;;  %vm287_vm0 = vmmov 0   ;;  %v288_v6 = vmov 0.0   ;;  %v199_v7 = vld [vmem:[%s386_s4] ss:$0 sm:$0xff] }
  0x15   :  { %59 = vperm.xlu1 %233, %v44_v1   ;;  %49 = vperm.xlu0 %232, %v42_v2   ;;  %v81_v11 = vld [vmem:[#allocation3] sm:$0xff]  ;;  %v83_v13 = vld [vmem:[#allocation3 + $0x10] sm:$0xff]  ;;  %v84_v14 = vld [vmem:[#allocation3 + $0x18] sm:$0xff]  ;;  %vm109_vm1 = vcmask 261120  }
  0x16   :  { %218 = vmatprep.subr.bf16.mxu0 %v286_v5  ;;  %215 = vmatprep.mubr.msk.f32.mxu0 %vm287_vm0, %v288_v6  ;;  %v82_v16 = vld [vmem:[#allocation3 + $0x8] sm:$0xff]  ;;  %v77_v21 = vld [vmem:[%s383_s1] sm:$0xff]  ;;  %v79_v26 = vld [vmem:[%s383_s1 + $0x10] sm:$0xff] }
  0x17   :  { %v78_v22 = vld [vmem:[%s383_s1 + $0x8] sm:$0xff]  ;;  %v80_v27 = vld [vmem:[%s383_s1 + $0x18] sm:$0xff]  ;;  %v97_v34 = vld [vmem:[%s382_s0] sm:$0xff]  ;;  %s289_s1 = smov [#allocation6]  }
  0x18   :  { %v200_v35 = vld [vmem:[%s387_s5] ss:$0 sm:$0xff]  ;;  %s190_s30 = sshll.u32 %s289_s1, 4  ;;  %s191_s30 = int_to_ptr.vmem [resolvable:$true] %s190_s30 }
  0x19   :  { %64 = vperm.xlu1 %233, %v45_v3   ;;  %54 = vperm.xlu0 %232, %v43_v4   ;;  %s256_s7 = scalar_lea.vmem %s191_s30, 128  ;;  %p261_p9 = scmp.lt.s32.totalorder %s191_s30, %s191_s30 }
  0x1a   :  { %p257_p8 = scmp.ne.s32.totalorder %s191_s30, %s256_s7  ;;  %p262_p10 = scmp.lt.s32.totalorder %s256_s7, %s256_s7 }
  0x1c   :  { %p263_p11 = por %p262_p10, %p261_p9 }
  0x1e   :  { %p264_p12 = pnand %p263_p11, %p257_p8 }
  0x94   :  { %v60_v8 = vpop.permute.xlu1 %59  ;;  %v50_v9 = vpop.permute.xlu0 %49 }
  0x95   :  { %v73_v10 = vmul.f32 %v199_v7, %v50_v9  ;;  %v75_v12 = vmul.f32 %v199_v7, %v60_v8 }
  0x97   :  { %v85_v18 = vmul.f32 %v81_v11, %v73_v10  ;;  %v87_v23 = vmul.f32 %v83_v13, %v75_v12 }
  0x98   :  { %v65_v15 = vpop.permute.xlu1 %64  ;;  %v55_v17 = vpop.permute.xlu0 %54 }
  0x99   :  { %v76_v19 = vmul.f32 %v199_v7, %v65_v15  ;;  %v74_v20 = vmul.f32 %v199_v7, %v55_v17  ;;  %v89_v28 = vadd.f32 %v85_v18, %v77_v21  ;;  %v91_v30 = vadd.f32 %v87_v23, %v79_v26 }
  0x9b   :  { %v88_v24 = vmul.f32 %v84_v14, %v76_v19  ;;  %v86_v25 = vmul.f32 %v82_v16, %v74_v20 }
  0x9d   :  { %v90_v29 = vadd.f32 %v86_v25, %v78_v22  ;;  %v92_v31 = vadd.f32 %v88_v24, %v80_v27 }
  0x9f   :  { %v219_v32 = vpack.c.bf16 %v90_v29, %v89_v28  ;;  %v222_v33 = vpack.c.bf16 %v92_v31, %v91_v30 }
  0xa1   :  { %220 = vmatpush3.bf16.msra.mxu0 %v219_v32 }
  0xa2   :  { %221 = vmatprep.subr.bf16.mxu0 %v286_v5 }
  0xa5   :  { %223 = vmatpush3.bf16.msra.mxu0 %v222_v33 }
  0xa8   :  { %216 = vmatmul.mubr.msk.f32.vlgmr.msra.gmra.mrb[0].mxu0 %vm109_vm1, %v97_v34 }
 0x17b   :  { %v179_v36 = vpop.f32.mrb[0].mxu0 }
 0x17c   :  { %v180_v37 = vadd.f32 %v200_v35, %v179_v36  ;;  %v217_v38 = vpop.f32.mrb[1].mxu0 }
 0x17e   :  { %183 = vst [vmem:[#allocation6] sm:$0xff] %v180_v37 }
 0x17f   :  { %267 = shalt.err (!%p264_p12)
}
 0x180   :  { %s268_s9 = scalar_lea.hbm %s388_s6, 128 }
 0x181   :  { %p269_p13 = scmp.ne.s32.totalorder %s388_s6, %s268_s9  ;;  %p272_p0 = scmp.lt.u32.totalorder %s268_s9, %s388_s6 }
 0x183   :  { %p274_p1 = pnand %p272_p0, %p269_p13 }
 0x185   :  { %277 = shalt.err (!%p274_p1)
}
 0x186   :  { %193 = dma.vmem_to_hbm [thread:$0]  %s191_s30, 128, %s388_s6, [#allocation5]  }
 0x187   :  { %280 = dma.done.wait [#allocation5], 128  }
 0x188   :  { %281 = vsyncadd [#allocation5], 4294967168 }
 0x189   :  { %197 = vsyncpa [#allocation4], 1 }
 0x18a   :  { %198 = vsyncpa [#allocation5], 1 }

</bundles_post_ra>
